<compile_context>
chip_gen: v7x
topology: tpu7x:2x2x1
jax: 0.10.0
libtpu: 0.0.40
codegen_flags: <defaults>
</compile_context>

<pallas_src>
import functools

import jax
import jax.numpy as jnp
import numpy as np
from jax import lax
from jax.experimental import pallas as pl
from jax.experimental.pallas import tpu as pltpu

EPS = 1e-5


def _round_up(a, b):
    return (a + b - 1) // b * b


def _matmul_stats_kernel(w_ref, a_ref, colv_ref, rowv_ref, y_ref, s1_ref, s2_ref):
    """One M tile: (Ppad,Kpad)bf16 @ (Kpad,TM)bf16 -> f32 accum; bf16 y + masked BN sums."""
    y = jnp.dot(w_ref[...], a_ref[...], preferred_element_type=jnp.float32)
    y_ref[...] = y.astype(y_ref.dtype)          # bf16 intermediate (halves HBM traffic)
    # Validity mask: phase offset < (Ho - s*q) per spatial direction.  Positions that
    # the phase decomposition over-computes (cropped later) and padded rows/columns
    # must not enter the BatchNorm statistics.
    valid = ((rowv_ref[:, 0:1] < colv_ref[0:1, :]) &
             (rowv_ref[:, 1:2] < colv_ref[1:2, :]))
    ym = jnp.where(valid, y, 0.0)
    s1_ref[...] = jnp.sum(ym, axis=1, keepdims=True)[None]        # (1, Ppad, 1)
    s2_ref[...] = jnp.sum(ym * ym, axis=1, keepdims=True)[None]   # (1, Ppad, 1)


@functools.partial(jax.jit, static_argnames=("stride", "padding", "tile_m"))
def conv_transpose_norm2d(x, weight, gamma, beta, *, stride, padding, tile_m=None):
    """x: (N, Cin, H, W); weight: (Cin, Cout, K, K) -- PyTorch ConvTranspose2d layout."""
    N, Cin, H, W = x.shape
    _, Cout, K, _ = weight.shape
    s, p = stride, padding

    Ho = (H - 1) * s + K - 2 * p
    Wo = (W - 1) * s + K - 2 * p
    Qh = -(-Ho // s)                   # outputs per phase (common, over-covering) range
    Qw = -(-Wo // s)

    # ---- sub-pixel (phase) decomposition:  oh = s*q + f'  (reindexed phase f') ----
    phase_info = []
    offs_lo, offs_hi = [], []
    for fp in range(s):
        f = (fp + p) % s                       # original kernel-tap phase
        d = (f - p - fp) // s                  # exact: f - p = s*d + fp
        J = 0 if f >= K else (K - 1 - f) // s + 1
        phase_info.append((f, d, J))
        if J > 0:
            offs_lo.append(-d - J + 1)
            offs_hi.append(-d)
    A0 = min(offs_lo)
    U = max(offs_hi) - A0 + 1                  # common patch width per direction (~ceil(K/s))

    # ---- phase-stacked weight matrix (s*s*Cout, Cin*U*U); rows (f'h, f'w, co) ----
    wrows = []
    for fph in range(s):
        fh, dh, Jh = phase_info[fph]
        for fpw in range(s):
            fw, dw, Jw = phase_info[fpw]
            wm = jnp.zeros((Cout, Cin, U, U), weight.dtype)
            for uh in range(U):
                jh = -dh - A0 - uh
                if not (0 <= jh < Jh):
                    continue
                kh = fh + s * jh
                for uw in range(U):
                    jw = -dw - A0 - uw
                    if not (0 <= jw < Jw):
                        continue
                    kw = fw + s * jw
                    wm = wm.at[:, :, uh, uw].set(weight[:, :, kh, kw].T)
            wrows.append(wm)
    Wt = jnp.stack(wrows, axis=0).reshape(s * s * Cout, Cin * U * U)

    # ---- im2col over the *original* input (no zero upsample) ----
    pad_lo_h = max(0, -A0)
    pad_hi_h = max(0, (Qh - 1) + A0 + (U - 1) - (H - 1))
    pad_lo_w = max(0, -A0)
    pad_hi_w = max(0, (Qw - 1) + A0 + (U - 1) - (W - 1))
    xp = jnp.pad(x, ((0, 0), (0, 0), (pad_lo_h, pad_hi_h), (pad_lo_w, pad_hi_w)))
    bh = A0 + pad_lo_h
    bw = A0 + pad_lo_w
    cols = [xp[:, :, bh + uh: bh + uh + Qh, bw + uw: bw + uw + Qw]
            for uh in range(U) for uw in range(U)]
    patches = jnp.stack(cols, axis=2)                            # (N, Cin, U*U, Qh, Qw)
    M = N * Qh * Qw
    Kdim = Cin * U * U
    At = patches.transpose(1, 2, 0, 3, 4).reshape(Kdim, M)       # rows (ci,uh,uw), cols (n,qh,qw)
    # TODO(synk): replace this host-side im2col with in-kernel window extraction from a
    # raw (Cin, h-slab, W) DMA to remove the U^2x HBM duplication.

    # ---- hardware-friendly padding + bf16 MXU inputs ----
    Pcout = s * s * Cout
    Ppad = _round_up(Pcout, 16)            # bf16 sublane packing for y rows / W rows
    Kpad = _round_up(Kdim, 16)             # bf16 sublane packing of the contraction dim
    if tile_m is not None:
        TM = tile_m
    else:
        # >= 2 lane-dense tiles so the "parallel" M axis shards over both v7x TCs;
        # per-tile VMEM is ~2*TM*(2*Kpad + 2*Ppad) bytes, so TM=2048 is trivially cheap.
        TM = min(2048, max(128, _round_up(-(-M // 2), 128)))
    Mpad = _round_up(M, TM)
    n_tiles = Mpad // TM

    At = jnp.pad(At, ((0, Kpad - Kdim), (0, Mpad - M))).astype(jnp.bfloat16)
    Wt = jnp.pad(Wt, ((0, Ppad - Pcout), (0, Kpad - Kdim))).astype(jnp.bfloat16)
    # TODO(synk): on v7x, fp8 casts here would halve A/W DMA again (gate on tolerance).

    # ---- factored validity vectors for the BN-stat mask (static, tiny) ----
    m_idx = np.arange(Mpad)
    qh_idx = (m_idx % (Qh * Qw)) // Qw
    qw_idx = m_idx % Qw
    col_lim = np.zeros((2, Mpad), np.int32)                      # padded cols stay 0 -> invalid
    col_lim[0, :M] = Ho - s * qh_idx[:M]
    col_lim[1, :M] = Wo - s * qw_idx[:M]
    r_idx = np.arange(Ppad)
    row_phi = np.full((Ppad, 2), 1 << 20, np.int32)              # padded rows -> invalid
    row_phi[:Pcout, 0] = r_idx[:Pcout] // (s * Cout)
    row_phi[:Pcout, 1] = (r_idx[:Pcout] // Cout) % s
    col_lim = jnp.asarray(col_lim)
    row_phi = jnp.asarray(row_phi)

    vmem_limit = 32 * 1024 * 1024   # actual per-step footprint is ~0.2 MiB; well inside v7x

    # ---- single Pallas pass: MXU matmul + per-tile masked BN partial sums ----
    y_cm, s1t, s2t = pl.pallas_call(
        _matmul_stats_kernel,
        out_shape=(jax.ShapeDtypeStruct((Ppad, Mpad), jnp.bfloat16),
                   jax.ShapeDtypeStruct((n_tiles, Ppad, 1), jnp.float32),
                   jax.ShapeDtypeStruct((n_tiles, Ppad, 1), jnp.float32)),
        grid=(n_tiles,),
        in_specs=(
            pl.BlockSpec((Ppad, Kpad), lambda i: (0, 0)),        # W: small, stays resident
            pl.BlockSpec((Kpad, TM), lambda i: (0, i)),          # A: lane-dense M tile
            pl.BlockSpec((2, TM), lambda i: (0, i)),             # per-column validity limits
            pl.BlockSpec((Ppad, 2), lambda i: (0, 0)),           # per-row phase offsets
        ),
        out_specs=(
            pl.BlockSpec((Ppad, TM), lambda i: (0, i)),          # lane-dense bf16 y tile
            pl.BlockSpec((1, Ppad, 1), lambda i: (i, 0, 0)),     # per-tile sum
            pl.BlockSpec((1, Ppad, 1), lambda i: (i, 0, 0)),     # per-tile sum of squares
        ),
        compiler_params=pltpu.CompilerParams(
            dimension_semantics=("parallel",),
            vmem_limit_bytes=vmem_limit),
        cost_estimate=pl.CostEstimate(
            flops=2 * Ppad * Kpad * Mpad,
            transcendentals=0,
            bytes_accessed=(Kpad * Mpad * 2 + Ppad * Kpad * 2 + Ppad * Mpad * 2
                            + 2 * n_tiles * Ppad * 4 + 2 * Mpad * 4 + Ppad * 2 * 4)),
    )(Wt, At, col_lim, row_phi)

    # ---- tiny per-channel combine (Cout scalars, f32) ----
    count = N * Ho * Wo
    tot1 = jnp.sum(s1t[:, :Pcout, 0], axis=0).reshape(s * s, Cout).sum(axis=0)
    tot2 = jnp.sum(s2t[:, :Pcout, 0], axis=0).reshape(s * s, Cout).sum(axis=0)
    mean = tot1 / count
    # E[y^2] - mean^2 with a clamp; fine at this activation scale.
    # TODO(synk): shifted sum-of-squares if |mean| >> std in a production setting.
    var = jnp.maximum(tot2 / count - mean * mean, 0.0)
    inv_std = lax.rsqrt(var + EPS)
    scale = (gamma * inv_std).astype(jnp.float32)
    shift = (beta - mean * gamma * inv_std).astype(jnp.float32)

    # ---- epilogue: affine fused by XLA into the one pixel-shuffle/crop copy that
    # rebuilds NCHW from the phase-stacked layout (no separate BN-apply pass). ----
    y = y_cm[:Pcout, :M].astype(jnp.float32).reshape(s, s, Cout, N, Qh, Qw)
    y = y * scale.reshape(1, 1, Cout, 1, 1, 1) + shift.reshape(1, 1, Cout, 1, 1, 1)
    out = y.transpose(3, 2, 4, 0, 5, 1).reshape(N, Cout, s * Qh, s * Qw)
    return out[:, :, :Ho, :Wo]


def _reference(x, weight, gamma, beta, *, stride, padding):
    """Pure-JAX reference: lax conv with lhs dilation + full BatchNorm (batch stats)."""
    Cin, Cout, K, _ = weight.shape
    w_conv = jnp.flip(weight, axis=(2, 3)).transpose(1, 0, 2, 3)   # (Cout, Cin, K, K)
    pad = K - 1 - padding
    y = lax.conv_general_dilated(
        x, w_conv, window_strides=(1, 1),
        padding=[(pad, pad), (pad, pad)],
        lhs_dilation=(stride, stride),
        dimension_numbers=("NCHW", "OIHW", "NCHW"))
    mean = y.mean(axis=(0, 2, 3), keepdims=True)
    var = jnp.square(y - mean).mean(axis=(0, 2, 3), keepdims=True)
    yhat = (y - mean) * lax.rsqrt(var + EPS)
    return yhat * gamma.reshape(1, -1, 1, 1) + beta.reshape(1, -1, 1, 1)


if __name__ == "__main__":
    # module config
    in_channels, out_channels, kernel_size, stride, padding = 4, 8, 3, 2, 1
    N, H, W = 2, 16, 16

    key = jax.random.PRNGKey(0)
    kx, kw = jax.random.split(key)
    x = jax.random.normal(kx, (N, in_channels, H, W), dtype=jnp.float32)

    # deterministic parameter init (matches module __init__):
    #   conv.weight ~ N(0, 0.02), shape (Cin, Cout, K, K); norm.weight=1, norm.bias=0
    weight = 0.02 * jax.random.normal(
        kw, (in_channels, out_channels, kernel_size, kernel_size), dtype=jnp.float32)
    gamma = jnp.ones((out_channels,), jnp.float32)
    beta = jnp.zeros((out_channels,), jnp.float32)

    out = conv_transpose_norm2d(x, weight, gamma, beta, stride=stride, padding=padding)
    out = jax.block_until_ready(out)

    ref = _reference(x, weight, gamma, beta, stride=stride, padding=padding)
    # bf16 MXU inputs + bf16 y intermediate vs. all-f32 reference -> loosened tolerance
    np.testing.assert_allclose(np.asarray(out), np.asarray(ref), rtol=2e-2, atol=2e-2)

    print("KERNEL_OK")
</pallas_src>

<mosaic_0001>
module attributes {stable_mosaic.version = 11 : i64} {
  func.func @_matmul_stats_kernel(%arg0: i32, %arg1: memref<32x16xbf16, #tpu.memory_space<vmem>>, %arg2: memref<16x256xbf16, #tpu.memory_space<vmem>>, %arg3: memref<2x256xi32, #tpu.memory_space<vmem>>, %arg4: memref<32x2xi32, #tpu.memory_space<vmem>>, %arg5: memref<32x256xbf16, #tpu.memory_space<vmem>>, %arg6: memref<1x32x1xf32, #tpu.memory_space<vmem>>, %arg7: memref<1x32x1xf32, #tpu.memory_space<vmem>>) attributes {dimension_semantics = [#tpu.dimension_semantics<parallel>], iteration_bounds = array<i64: 2>, scalar_prefetch = 0 : i64, scratch_operands = 0 : i64, tpu.core_type = #tpu.core_type<tc>, window_params = [{pipeline_mode = #tpu.pipeline_mode<synchronous>, transform_indices = @transform_0, window_bounds = array<i64: 32, 16>}, {transform_indices = @transform_1, window_bounds = array<i64: 16, 256>}, {transform_indices = @transform_2, window_bounds = array<i64: 2, 256>}, {pipeline_mode = #tpu.pipeline_mode<synchronous>, transform_indices = @transform_3, window_bounds = array<i64: 32, 2>}, {transform_indices = @transform_4, window_bounds = array<i64: 32, 256>}, {transform_indices = @transform_5, window_bounds = array<i64: 1, 32, 1>}, {transform_indices = @transform_6, window_bounds = array<i64: 1, 32, 1>}]} {
    %c0 = arith.constant 0 : index
    %c0_0 = arith.constant 0 : index
    %0 = vector.load %arg1[%c0, %c0_0] : memref<32x16xbf16, #tpu.memory_space<vmem>>, vector<32x16xbf16>
    %c0_1 = arith.constant 0 : index
    %c0_2 = arith.constant 0 : index
    %1 = vector.load %arg2[%c0_1, %c0_2] : memref<16x256xbf16, #tpu.memory_space<vmem>>, vector<16x256xbf16>
    %cst = arith.constant dense<0.000000e+00> : vector<32x256xf32>
    %2 = tpu.matmul %0, %1, %cst {dimension_numbers = #tpu.dot_dimension_numbers<[1], [0], [0], [1], [0, 0, 1, 1], [], []>} : vector<32x16xbf16>, vector<16x256xbf16>, vector<32x256xf32> -> vector<32x256xf32>
    %3 = arith.truncf %2 : vector<32x256xf32> to vector<32x256xbf16>
    %c0_3 = arith.constant 0 : index
    %c0_4 = arith.constant 0 : index
    %4 = vector.load %arg5[%c0_3, %c0_4] : memref<32x256xbf16, #tpu.memory_space<vmem>>, vector<32x256xbf16>
    tpu.vector_store %arg5[%c0_3, %c0_4], %3 {strides = array<i32>} : memref<32x256xbf16, #tpu.memory_space<vmem>>, vector<32x256xbf16>,
    %c0_5 = arith.constant 0 : index
    %c0_6 = arith.constant 0 : index
    %5 = vector.load %arg4[%c0_5, %c0_6] : memref<32x2xi32, #tpu.memory_space<vmem>>, vector<32x1xi32>
    %c0_7 = arith.constant 0 : index
    %c0_8 = arith.constant 0 : index
    %6 = vector.load %arg3[%c0_7, %c0_8] : memref<2x256xi32, #tpu.memory_space<vmem>>, vector<1x256xi32>
    %7 = vector.broadcast %5 : vector<32x1xi32> to vector<32x256xi32>
    %8 = vector.broadcast %6 : vector<1x256xi32> to vector<32x256xi32>
    %9 = arith.cmpi slt, %7, %8 : vector<32x256xi32>
    %c0_9 = arith.constant 0 : index
    %c1 = arith.constant 1 : index
    %10 = vector.load %arg4[%c0_9, %c1] : memref<32x2xi32, #tpu.memory_space<vmem>>, vector<32x1xi32>
    %c1_10 = arith.constant 1 : index
    %c0_11 = arith.constant 0 : index
    %11 = vector.load %arg3[%c1_10, %c0_11] : memref<2x256xi32, #tpu.memory_space<vmem>>, vector<1x256xi32>
    %12 = vector.broadcast %10 : vector<32x1xi32> to vector<32x256xi32>
    %13 = vector.broadcast %11 : vector<1x256xi32> to vector<32x256xi32>
    %14 = arith.cmpi slt, %12, %13 : vector<32x256xi32>
    %15 = arith.andi %9, %14 : vector<32x256xi1>
    %cst_12 = arith.constant 0.000000e+00 : f32
    %16 = vector.broadcast %cst_12 : f32 to vector<32x256xf32>
    %17 = arith.select %15, %2, %16 : vector<32x256xi1>, vector<32x256xf32>
    %cst_13 = arith.constant dense<0.000000e+00> : vector<32xf32>
    %18 = vector.multi_reduction <add>, %17, %cst_13 [1] : vector<32x256xf32> to vector<32xf32>
    %19 = vector.shape_cast %18 : vector<32xf32> to vector<32x1xf32>
    %20 = vector.shape_cast %19 : vector<32x1xf32> to vector<1x32x1xf32>
    %c0_14 = arith.constant 0 : index
    %c0_15 = arith.constant 0 : index
    %c0_16 = arith.constant 0 : index
    %21 = vector.load %arg6[%c0_14, %c0_15, %c0_16] : memref<1x32x1xf32, #tpu.memory_space<vmem>>, vector<1x32x1xf32>
    tpu.vector_store %arg6[%c0_14, %c0_15, %c0_16], %20 {strides = array<i32>} : memref<1x32x1xf32, #tpu.memory_space<vmem>>, vector<1x32x1xf32>,
    %22 = arith.mulf %17, %17 : vector<32x256xf32>
    %cst_17 = arith.constant dense<0.000000e+00> : vector<32xf32>
    %23 = vector.multi_reduction <add>, %22, %cst_17 [1] : vector<32x256xf32> to vector<32xf32>
    %24 = vector.shape_cast %23 : vector<32xf32> to vector<32x1xf32>
    %25 = vector.shape_cast %24 : vector<32x1xf32> to vector<1x32x1xf32>
    %c0_18 = arith.constant 0 : index
    %c0_19 = arith.constant 0 : index
    %c0_20 = arith.constant 0 : index
    %26 = vector.load %arg7[%c0_18, %c0_19, %c0_20] : memref<1x32x1xf32, #tpu.memory_space<vmem>>, vector<1x32x1xf32>
    tpu.vector_store %arg7[%c0_18, %c0_19, %c0_20], %25 {strides = array<i32>} : memref<1x32x1xf32, #tpu.memory_space<vmem>>, vector<1x32x1xf32>,
    return
  }
  func.func @transform_0(%arg0: i32) -> (i32, i32) {
    %c0_i32 = arith.constant 0 : i32
    %c0_i32_0 = arith.constant 0 : i32
    %c0_i32_1 = arith.constant 0 : i32
    return %c0_i32, %c0_i32_0 : i32, i32
  }
  func.func @transform_1(%arg0: i32) -> (i32, i32) {
    %c0_i32 = arith.constant 0 : i32
    %c0_i32_0 = arith.constant 0 : i32
    return %c0_i32, %arg0 : i32, i32
  }
  func.func @transform_2(%arg0: i32) -> (i32, i32) {
    %c0_i32 = arith.constant 0 : i32
    %c0_i32_0 = arith.constant 0 : i32
    return %c0_i32, %arg0 : i32, i32
  }
  func.func @transform_3(%arg0: i32) -> (i32, i32) {
    %c0_i32 = arith.constant 0 : i32
    %c0_i32_0 = arith.constant 0 : i32
    %c0_i32_1 = arith.constant 0 : i32
    return %c0_i32, %c0_i32_0 : i32, i32
  }
  func.func @transform_4(%arg0: i32) -> (i32, i32) {
    %c0_i32 = arith.constant 0 : i32
    %c0_i32_0 = arith.constant 0 : i32
    return %c0_i32, %arg0 : i32, i32
  }
  func.func @transform_5(%arg0: i32) -> (i32, i32, i32) {
    %c0_i32 = arith.constant 0 : i32
    %c0_i32_0 = arith.constant 0 : i32
    %c0_i32_1 = arith.constant 0 : i32
    return %arg0, %c0_i32, %c0_i32_0 : i32, i32, i32
  }
  func.func @transform_6(%arg0: i32) -> (i32, i32, i32) {
    %c0_i32 = arith.constant 0 : i32
    %c0_i32_0 = arith.constant 0 : i32
    %c0_i32_1 = arith.constant 0 : i32
    return %arg0, %c0_i32, %c0_i32_0 : i32, i32, i32
  }
}

</mosaic_0001>

<bundles_post_ra>
// kernel: conv_transpose_norm2d.1
= control target key start
LH: loop header
LB: loop body
LE: loop exit
PB: predicated region body
PF: predicated region fallthrough
CT: control target
= control target key end

     0   :  { %s895_s21 = smov 0   ;;  %s897_s22 = smov 0   ;;  %s1027_s0 = inlined_call_operand.vmem [shape: bf16[32,16], index: 0, kind: input, shape index: {}]   ;;  %s1028_s1 = inlined_call_operand.vmem [shape: bf16[16,512], index: 1, kind: input, shape index: {}]   ;;  %s1029_s2 = inlined_call_operand.vmem [shape: s32[2,512], index: 2, kind: input, shape index: {}]   ;;  %s1030_s3 = inlined_call_operand.vmem [shape: s32[32,2], index: 3, kind: input, shape index: {}]   ;;  %s1031_s4 = inlined_call_operand.vmem [shape: bf16[32,512], index: 4, kind: output, shape index: {0}]   ;;  %s1032_s5 = inlined_call_operand.vmem [shape: f32[2,32,1], index: 5, kind: output, shape index: {1}]   ;;  %s1033_s6 = inlined_call_operand.vmem [shape: f32[2,32,1], index: 6, kind: output, shape index: {2}]  }
   0x1   :  { %s899_s23 = smov 0  }
   0x2 LB: > { %s908_s24 = sadd.s32 4294967295, %s856_s23   ;;  %s910_s25 = sadd.s32 1, %s856_s23   ;;  %s856_s23 = sphi %s899_s23, %s1044_s23   ;;  %s852_s22 = sphi %s897_s22, %s1043_s22   ;;  %s848_s21 = sphi %s895_s21, %s1042_s21  }
   0x3   : > { %s42_s26 = ssub.s32 %s856_s23, %s910_s25  ;;  %s45_s27 = sadd.s32 1, %s852_s22 }
   0x4   : > { %p43_p0 = scmp.eq.s32.totalorder %s42_s26, 0  ;;  %p52_p1 = scmp.ne.s32.totalorder %s852_s22, %s848_s21 }
   0x5   : > { %p53_p2 = scmp.eq.s32.totalorder %s856_s23, 0  ;;  %p129_p3 = scmp.eq.s32.totalorder %s908_s24, 1 }
   0x6   : > { %s918_s28 = scalar_select %p43_p0, %s852_s22, %s45_s27  }
   0x7   : > { %p54_p4 = por %p53_p2, %p52_p1  ;;  %p920_p5 = por %p129_p3, %p52_p1 }
   0x8   : > { %p760_p6 = scmp.ge.s32.totalorder %s856_s23, 2 }
   0xa   : > { %209 = sbr.rel (%p760_p6) target bundleno = 24 (0x18), region = 24 }
  0x11   : > { %212 = sbr.rel (!%p54_p4) target bundleno = 24 (0x18), region = 28  ;;  %s214_s30 = sand.u32 (%p54_p4), 1, %s852_s22  }
  0x12   : > { %s789_s7 = sshll.u32 (%p54_p4), %s856_s23, 3  ;;  %s761_s8 = sshll.u32 (%p54_p4), %s214_s30, 4 }
  0x13   : > { %s219_s11 = scalar_lea.vmem (%p54_p4), %s1028_s1, %s789_s7  ;;  %s216_s12 = scalar_lea.vmem (%p54_p4), [#allocation2], %s761_s8 }
  0x14   : > { %v249_v0 = vld [vmem:[%s219_s11] sm:$0xff] (%p54_p4)  ;;  %v251_v1 = vld [vmem:[%s219_s11 + $0x10] sm:$0xff] (%p54_p4) }
  0x15   : > { %250 = vst [vmem:[%s216_s12] sm:$0xff] (%p54_p4), %v249_v0  ;;  %252 = vst [vmem:[%s216_s12 + $0x8] sm:$0xff] (%p54_p4), %v251_v1 }
  0x18 PF: > { %p764_p7 = scmp.ge.s32.totalorder %s856_s23, 1  ;;  %p266_p8 = scmp.lt.s32.totalorder %s856_s23, 3 }
  0x1a   : > { %p267_p9 = pnand %p764_p7, %p266_p8 }
  0x1b   : > { %s273_s13 = sand.u32 (!%p267_p9), 1, %s848_s21   ;;  %v858_v2 = vmov (!%p267_p9), 0   ;;  %v451_v3 = vld [vmem:[%s1030_s3 + $0x10] sm:$0xff] (!%p267_p9)  ;;  %v449_v6 = vld [vmem:[%s1030_s3] sm:$0xff] (!%p267_p9)  ;;  %v452_v7 = vld [vmem:[%s1030_s3 + $0x18] sm:$0xff] (!%p267_p9)  ;;  %vm361_vm0 = vcmask (!%p267_p9), 130048   ;;  %v466_v14 = vlaneseq (!%p267_p9) }
  0x1c   : > { %270 = sbr.rel (%p267_p9) target bundleno = 409 (0x199), region = 70  ;;  %s765_s14 = sshll.u32 (!%p267_p9), %s273_s13, 4  ;;  %400 = vmatprep.mubr.bf16.mxu0 (!%p267_p9), %v858_v2  ;;  %410 = vmatprep.mubr.bf16.mxu1 (!%p267_p9), %v858_v2  ;;  %v832_v8 = vld [vmem:[%s1027_s0] sm:$0xff] (!%p267_p9)   ;;  %v833_v9 = vld [vmem:[%s1027_s0 + $0x8] sm:$0xff] (!%p267_p9)   ;;  %v859_v11 = vmov (!%p267_p9), 1   ;;  %v1035_v30 = vmov (!%p267_p9), 0 }
  0x1d   : > { %826 = vset.pattern.permute.xlu1 (!%p267_p9), %v858_v2  ;;  %825 = vset.pattern.permute.xlu0 (!%p267_p9), %v858_v2  ;;  %s275_s17 = scalar_lea.vmem (!%p267_p9), [#allocation2], %s765_s14  ;;  %v450_v10 = vld [vmem:[%s1030_s3 + $0x8] sm:$0xff] (!%p267_p9)  ;;  %s767_s10 = sshll.u32 (!%p267_p9), %s908_s24, 1  ;;  %v467_v16 = vshrl.u32 (!%p267_p9), %v466_v14, 7 }
  0x1e   : > { %v829_v4 = vld [vmem:[%s275_s17 + $0x4] ss:$8 sps:$4 sm:$0xff] (!%p267_p9)   ;;  %461 = vperm.xlu1 (!%p267_p9), %826, %v451_v3   ;;  %v831_v5 = vld [vmem:[%s275_s17] ss:$8 sps:$4 sm:$0xff] (!%p267_p9)   ;;  %455 = vperm.xlu0 (!%p267_p9), %825, %v449_v6   ;;  %p318_p10 = scmp.lt.s32.totalorder (!%p267_p9), %s767_s10, 3  ;;  %s961_s16 = sshll.u32 (!%p267_p9), %s273_s13, 5 }
  0x1f   : > { %368 = vmatprep.subr.bf16.mxu0 (!%p267_p9), %v829_v4  ;;  %797 = vmatprep.subr.bf16.mxu1 (!%p267_p9), %v829_v4  ;;  %v468_v18 = vsub.s32 (!%p267_p9), 0, %v467_v16  ;;  %v472_v19 = vsub.s32 (!%p267_p9), 1, %v467_v16  ;;  %s980_s21 = scalar_lea.vmem (!%p267_p9), [#allocation3], %s961_s16  ;;  %p324_p11 = scmp.lt.s32.totalorder (!%p267_p9), %s908_s24, 1 }
  0x20   : > { %369 = vmatpush1.bf16.msra.mxu0 (!%p267_p9), %v831_v5  ;;  %798 = vmatpush1.bf16.msra.mxu1 (!%p267_p9), %v831_v5 }
  0x22   : > { %464 = vperm.xlu1 (!%p267_p9), %826, %v452_v7   ;;  %458 = vperm.xlu0 (!%p267_p9), %825, %v450_v10  }
  0x23   : > { %777 = vmatmul.mubr.msk.bf16.vlgmr.msra.gmra.mrb[0].mxu0 %vm361_vm0, %v832_v8  ;;  %778 = vmatmul.mubr.msk.bf16.vlgmr.msra.gmra.mrb[0].mxu1 %vm361_vm0, %v833_v9  ;;  %s1046_s10 = smov (!%p318_p10, %s767_s10), 3  ;;  %s796_s30 = sshll.u32 (%p920_p5), %s908_s24, 3 }
  0x24   : > { %s768_s11 = sshll.u32 %s1046_s10, 1  ;;  %s588_s9 = scalar_lea.vmem (%p920_p5), %s1031_s4, %s796_s30 }
  0x25   : > { %s321_s15 = scalar_lea.vmem %s1029_s2, %s768_s11 }
  0x26   : > { %828 = vset.pattern.permute.xlu1 %v859_v11  ;;  %827 = vset.pattern.permute.xlu0 %v859_v11  ;;  %v453_v21 = vld [vmem:[%s321_s15] ss:$2 sm:$0x3]  ;;  %v783_v22 = vld [vmem:[%s321_s15 + $0x1] ss:$2 sm:$0x3] }
  0x27   : > { %488 = vperm.xlu1 %828, %v450_v10   ;;  %485 = vperm.xlu0 %827, %v449_v6   ;;  %v469_v24 = vrot.slane %v453_v21, %v468_v18  ;;  %v499_v25 = vrot.slane %v783_v22, %v468_v18  ;;  %v473_v26 = vrot.slane %v453_v21, %v472_v19  ;;  %s325_s13 = scalar_select %p324_p11, %s908_s24, 1 }
  0x28   : > { %v503_v27 = vrot.slane %v783_v22, %v472_v19 }
  0x29   : > { %s790_s17 = sshll.u32 %s325_s13, 5 }
  0x2a   : > { %s328_s20 = scalar_lea.vmem %s1032_s5, %s790_s17  ;;  %s333_s27 = scalar_lea.vmem %s1033_s6, %s790_s17 }
  0x2b   : > { %491 = vperm.xlu1 %828, %v451_v3   ;;  %494 = vperm.xlu0 %827, %v452_v7  }
  0x9d   : > { %v462_v12 = vpop.permute.xlu1 %461  ;;  %v456_v13 = vpop.permute.xlu0 %455 }
  0x9e   : > { %vm474_vm5 = vcmp.lt.s32.totalorder %v456_v13, %v469_v24  ;;  %vm479_vm13 = vcmp.lt.s32.totalorder %v462_v12, %v473_v26 }
  0xa1   : > { %v950_v15 = vpop.permute.xlu1 %464  ;;  %v459_v17 = vpop.permute.xlu0 %458 }
  0xa2   : > { %vm476_vm1 = vcmp.lt.s32.totalorder %v459_v17, %v469_v24  ;;  %vm477_vm3 = vcmp.lt.s32.totalorder %v459_v17, %v473_v26  ;;  %vm480_vm0 = vcmp.lt.s32.totalorder %v950_v15, %v469_v24 }
  0xa6   : > { %v489_v20 = vpop.permute.xlu1 %488  ;;  %v486_v23 = vpop.permute.xlu0 %485 }
  0xa7   : > { %vm506_vm2 = vcmp.lt.s32.totalorder %v489_v20, %v499_v25  ;;  %vm507_vm4 = vcmp.lt.s32.totalorder %v489_v20, %v503_v27  ;;  %vm504_vm6 = vcmp.lt.s32.totalorder %v486_v23, %v499_v25  ;;  %vm505_vm11 = vcmp.lt.s32.totalorder %v486_v23, %v503_v27 }
  0xa8   : > { %vm955_vm9 = vmand %vm476_vm1, %vm506_vm2  ;;  %vm1039_vm1 = vcmp.lt.s32.totalorder %v462_v12, %v469_v24 }
  0xa9   : > { %v1036_v30 = vsel %vm955_vm9, 4294967295, %v1035_v30  ;;  %vm963_vm12 = vmand %vm477_vm3, %vm507_vm4  ;;  %vm481_vm9 = vcmp.lt.s32.totalorder %v950_v15, %v473_v26  ;;  %vm1040_vm3 = vcmp.lt.s32.totalorder %v456_v13, %v473_v26 }
  0xaa   : > { %v492_v28 = vpop.permute.xlu1 %491  ;;  %v495_v29 = vpop.permute.xlu0 %494  ;;  %vm512_vm15 = vmand %vm474_vm5, %vm504_vm6  ;;  %vm1041_vm6 = vnez %v1036_v30 }
  0xab   : > { %vm508_vm8 = vcmp.lt.s32.totalorder %v492_v28, %v499_v25  ;;  %vm509_vm14 = vcmp.lt.s32.totalorder %v492_v28, %v503_v27  ;;  %vm510_vm7 = vcmp.lt.s32.totalorder %v495_v29, %v499_v25  ;;  %vm511_vm10 = vcmp.lt.s32.totalorder %v495_v29, %v503_v27  ;;  %vm513_vm4 = vmand %vm1040_vm3, %vm505_vm11 }
  0xac   : > { %vm516_vm2 = vmand %vm1039_vm1, %vm508_vm8 }
  0xad   : > { %vm517_vm5 = vmand %vm479_vm13, %vm509_vm14 }
  0xae   : > { %vm518_vm8 = vmand %vm480_vm0, %vm510_vm7  ;;  %vm540_vm7 = vcmask 7168  }
  0xaf   : > { %vm519_vm11 = vmand %vm481_vm9, %vm511_vm10 }
  0xf6   : > { %v402_v32 = vpop.f32.mrb[0].mxu0  ;;  %v412_v33 = vpop.f32.mrb[0].mxu1 }
  0xf7   : > { %v520_v34 = vsel %vm512_vm15, %v402_v32, 0.0  ;;  %v524_v35 = vsel %vm516_vm2, %v412_v33, 0.0  ;;  %v404_v36 = vpop.f32.mrb[1].mxu0  ;;  %v414_v37 = vpop.f32.mrb[1].mxu1 }
  0xf8   : > { %v545_v38 = vmul.f32 %v520_v34, %v520_v34  ;;  %v549_v39 = vmul.f32 %v524_v35, %v524_v35  ;;  %v792_v40 = vpack.c.bf16 %v404_v36, %v402_v32  ;;  %v521_v41 = vsel %vm513_vm4, %v404_v36, 0.0  ;;  %v406_v42 = vpop.f32.mrb[2].mxu0  ;;  %v416_v43 = vpop.f32.mrb[2].mxu1 }
  0xf9   : > { %v546_v44 = vmul.f32 %v521_v41, %v521_v41  ;;  %v794_v45 = vpack.c.bf16 %v414_v37, %v412_v33  ;;  %v525_v46 = vsel %vm517_vm5, %v414_v37, 0.0  ;;  %v522_v47 = vsel %vm1041_vm6, %v406_v42, 0.0  ;;  %v408_v48 = vpop.f32.mrb[3].mxu0  ;;  %v418_v49 = vpop.f32.mrb[3].mxu1 }
  0xfa   : > { %445 = vst [vmem:[%s980_s21] sm:$0xff] %v792_v40  ;;  %v550_v50 = vmul.f32 %v525_v46, %v525_v46  ;;  %v547_v51 = vmul.f32 %v522_v47, %v522_v47  ;;  %v526_v52 = vsel %vm518_vm8, %v416_v43, 0.0  ;;  %v793_v53 = vpack.c.bf16 %v408_v48, %v406_v42 }
  0xfb   : > { %447 = vst [vmem:[%s980_s21 + $0x10] sm:$0xff] %v794_v45  ;;  %v551_v54 = vmul.f32 %v526_v52, %v526_v52  ;;  %v523_v55 = vsel %vm963_vm12, %v408_v48, 0.0  ;;  %v795_v56 = vpack.c.bf16 %v418_v49, %v416_v43  ;;  %v527_v57 = vsel %vm519_vm11, %v418_v49, 0.0 }
  0xfc   : > { %446 = vst [vmem:[%s980_s21 + $0x8] sm:$0xff] %v793_v53  ;;  %v548_v58 = vmul.f32 %v523_v55, %v523_v55  ;;  %v552_v59 = vmul.f32 %v527_v57, %v527_v57  ;;  %v534_v60 = vadd.f32 %v525_v46, %v524_v35  ;;  %v528_v61 = vadd.f32 %v521_v41, %v520_v34 }
  0xfd   : > { %448 = vst [vmem:[%s980_s21 + $0x18] sm:$0xff] %v795_v56  ;;  %v537_v62 = vadd.f32 %v527_v57, %v526_v52  ;;  %v531_v63 = vadd.f32 %v523_v55, %v522_v47  ;;  %v553_v0 = vadd.f32 %v546_v44, %v545_v38  ;;  %v559_v1 = vadd.f32 %v550_v50, %v549_v39 }
  0xfe   : > { %535 = vadd.xlane.f32.xlu0 %v534_v60  ;;  %529 = vadd.xlane.f32.xlu1 %v528_v61  ;;  %v556_v2 = vadd.f32 %v548_v58, %v547_v51  ;;  %v562_v3 = vadd.f32 %v552_v59, %v551_v54 }
 0x101   : > { %v622_v12 = vld [vmem:[%s980_s21] sm:$0xff] (%p920_p5) }
 0x102   : > { %538 = vadd.xlane.f32.xlu1 %v537_v62  ;;  %532 = vadd.xlane.f32.xlu0 %v531_v63  ;;  %v626_v14 = vld [vmem:[%s980_s21 + $0x10] sm:$0xff] (%p920_p5)  ;;  %623 = vst [vmem:[%s588_s9] sm:$0xff] (%p920_p5), %v622_v12 }
 0x103   : > { %v624_v13 = vld [vmem:[%s980_s21 + $0x8] sm:$0xff] (%p920_p5)  ;;  %627 = vst [vmem:[%s588_s9 + $0x20] sm:$0xff] (%p920_p5), %v626_v14 }
 0x104   : > { %v628_v15 = vld [vmem:[%s980_s21 + $0x18] sm:$0xff] (%p920_p5)  ;;  %625 = vst [vmem:[%s588_s9 + $0x10] sm:$0xff] (%p920_p5), %v624_v13 }
 0x105   : > { %629 = vst [vmem:[%s588_s9 + $0x30] sm:$0xff] (%p920_p5), %v628_v15 }
 0x106   : > { %557 = vadd.xlane.f32.xlu1 %v556_v2  ;;  %554 = vadd.xlane.f32.xlu0 %v553_v0 }
 0x10a   : > { %563 = vadd.xlane.f32.xlu1 %v562_v3  ;;  %560 = vadd.xlane.f32.xlu0 %v559_v1 }
 0x18b   : > { %v536_v4 = vpop.xlane.xlu0 %535  ;;  %v530_v5 = vpop.xlane.xlu1 %529 }
 0x18c   : > { %543 = vst.msk [vmem:[%s328_s20 + $0x10] sm:$0xff] %vm540_vm7, %v536_v4  ;;  %541 = vst.msk [vmem:[%s328_s20] sm:$0xff] %vm540_vm7, %v530_v5 }
 0x18f   : > { %v539_v6 = vpop.xlane.xlu1 %538  ;;  %v533_v7 = vpop.xlane.xlu0 %532 }
 0x190   : > { %544 = vst.msk [vmem:[%s328_s20 + $0x18] sm:$0xff] %vm540_vm7, %v539_v6  ;;  %542 = vst.msk [vmem:[%s328_s20 + $0x8] sm:$0xff] %vm540_vm7, %v533_v7 }
 0x192   : > { %585 = sbr.rel (!%p920_p5) target bundleno = 409 (0x199), region = 78 }
 0x193   : > { %v558_v8 = vpop.xlane.xlu1 %557  ;;  %v555_v9 = vpop.xlane.xlu0 %554 }
 0x194   : > { %566 = vst.msk [vmem:[%s333_s27 + $0x8] sm:$0xff] %vm540_vm7, %v558_v8  ;;  %565 = vst.msk [vmem:[%s333_s27] sm:$0xff] %vm540_vm7, %v555_v9 }
 0x197   : > { %v564_v10 = vpop.xlane.xlu1 %563  ;;  %v561_v11 = vpop.xlane.xlu0 %560 }
 0x198   : > { %568 = vst.msk [vmem:[%s333_s27 + $0x18] sm:$0xff] %vm540_vm7, %v564_v10  ;;  %567 = vst.msk [vmem:[%s333_s27 + $0x10] sm:$0xff] %vm540_vm7, %v561_v11 }
 0x199 PF: > { %p14_p12 = scmp.ge.s32.totalorder %s910_s25, 4   ;;  %s1042_s21 = smov %s852_s22 }
 0x19a   : > { %s1043_s22 = smov %s918_s28  ;;  %s1044_s23 = smov %s910_s25 }
 0x19b   :  { %16 = sbr.rel (!%p14_p12) target bundleno = 2 (0x2), region = 175 }

</bundles_post_ra>
